<compile_context>
chip_gen: v6e
topology: v6e:2x2x1
jax: 0.10.0
libtpu: 0.0.40
codegen_flags: <defaults>
</compile_context>

<pallas_src>
import functools

import jax
import jax.numpy as jnp
from jax import lax
from jax.experimental import pallas as pl
from jax.experimental.pallas import tpu as pltpu

# Module hyperparameters (mirrors SelfAttention(embed_size, seq_len, heads)).
EMBED_SIZE = 32
SEQ_LEN = 8
HEADS = 2
HEAD_DIM = SEQ_LEN // HEADS
N_BATCH = 2

_VMEM = pl.BlockSpec(memory_space=pltpu.MemorySpace.VMEM)


def _fused_self_attention_kernel(x_ref, w_ref, b_ref, out_ref, *,
                                 n_batch, heads, head_dim, seq_len, embed_size):
    """Fused forward.

    VMEM shapes:
      x_ref:   (N, E, S)
      w_ref:   (S, 2E + 3S)   packed: [wr_perm | Wq_bd | Wk_bd | Wv_bd | Wo^T]
      b_ref:   (S, 2S + E)    packed: col0 = br_perm; rows 0..2 of cols S:2S =
                              bq/bk/bv (all heads); row 0 of cols 2S: = bo
      out_ref: (N*S, E)       lane-dense 2-D result slab
    """
    S, hd, H, E, N = seq_len, head_dim, heads, embed_size, n_batch

    # ---- unpack the two packed operands (static slices, stay in VMEM) ------
    wr_p = w_ref[:, 0:E]                        # (S, E) row-permuted reduce_dim W
    wq_bd = w_ref[:, E:E + S]                   # (S, S) block-diagonal (in -> out)
    wk_bd = w_ref[:, E + S:E + 2 * S]
    wv_bd = w_ref[:, E + 2 * S:E + 3 * S]
    wo_t = w_ref[:, E + 3 * S:2 * E + 3 * S]    # (S, E) fc_out weight, transposed

    br_col = b_ref[:, 0:1]                      # (S, 1) permuted reduce_dim bias
    bq_row = b_ref[0:1, S:2 * S]                # (1, S) all-head Q bias
    bk_row = b_ref[1:2, S:2 * S]                # (1, S)
    bv_row = b_ref[2:3, S:2 * S]                # (1, S)
    bo_row = b_ref[0:1, 2 * S:2 * S + E]        # (1, E)

    # ---- reduce_dim: rows already in the permuted t' order ------------------
    r_flat = jnp.concatenate(
        [jnp.dot(wr_p, x_ref[n], preferred_element_type=jnp.float32) + br_col
         for n in range(N)],
        axis=0)                                                     # (N*S, S)

    # ---- Q/K/V for ALL heads: one dot each via block-diagonal weights -------
    q_all = jnp.dot(r_flat, wq_bd, preferred_element_type=jnp.float32) + bq_row
    k_all = jnp.dot(r_flat, wk_bd, preferred_element_type=jnp.float32) + bk_row
    v_all = jnp.dot(r_flat, wv_bd, preferred_element_type=jnp.float32) + bv_row

    # ---- per-(head, batch) softmax attention + fused fc_out -----------------
    # Block g = h*N + n produces output rows [g*hd, (g+1)*hd) of the final
    # (N*S, E) slab; the row permutation applied to wr makes this exactly the
    # module's raw (H, N, S, hd) -> (N, S, H*hd) flatten.
    for h in range(H):                 # g = h*N + n must iterate in this order
        for n in range(N):
            g = h * N + n
            q_blk = q_all[n * S:(n + 1) * S, h * hd:(h + 1) * hd]   # (S, hd)
            k_blk = k_all[n * S:(n + 1) * S, h * hd:(h + 1) * hd]
            v_blk = v_all[n * S:(n + 1) * S, h * hd:(h + 1) * hd]

            # scores = q @ k.T  (no 1/sqrt(d) scaling, matching the module)
            scores = lax.dot_general(q_blk, k_blk, (((1,), (1,)), ((), ())),
                                     preferred_element_type=jnp.float32)
            scores = scores - jnp.max(scores, axis=-1, keepdims=True)
            p = jnp.exp(scores)
            inv_den = pl.reciprocal(jnp.sum(p, axis=-1, keepdims=True),
                                    approx=True)
            w_att = p * inv_den                                     # (S, S)

            o_blk = jnp.dot(w_att, v_blk,
                            preferred_element_type=jnp.float32)     # (S, hd)

            # fc_out contribution of this block, decomposed over the H
            # sub-groups of rows (avoids any in-kernel reshape of o_blk).
            out_blk = bo_row                                        # (1, E) bcast
            for j in range(H):
                out_blk = out_blk + jnp.dot(
                    o_blk[j * hd:(j + 1) * hd, :],                  # (hd, hd)
                    wo_t[j * hd:(j + 1) * hd, :],                   # (hd, E)
                    preferred_element_type=jnp.float32)
            out_ref[g * hd:(g + 1) * hd, :] = out_blk               # (hd, E)


@jax.jit
def self_attention_forward(x, packed):
    """x: (N, embed_size, seq_len) -> (N, seq_len, embed_size)."""
    n, e, s = x.shape
    assert (e, s) == (EMBED_SIZE, SEQ_LEN)
    kernel = functools.partial(
        _fused_self_attention_kernel, n_batch=n, heads=HEADS,
        head_dim=HEAD_DIM, seq_len=SEQ_LEN, embed_size=EMBED_SIZE)
    # Grid-free single pallas_call; everything whole-array in VMEM.
    out2d = pl.pallas_call(
        kernel,
        out_shape=jax.ShapeDtypeStruct((n * s, EMBED_SIZE), jnp.float32),
        in_specs=[_VMEM, _VMEM, _VMEM],
        out_specs=_VMEM,
    )(x, packed['w'], packed['b'])
    return out2d.reshape(n, s, EMBED_SIZE)      # free row-major reshape under jit


def init_params(key):
    """Deterministic PyTorch-Linear-style init (uniform +/- 1/sqrt(fan_in))."""
    def linear(k, out_f, in_f):
        kw, kb = jax.random.split(k)
        bound = 1.0 / (in_f ** 0.5)
        w = jax.random.uniform(kw, (out_f, in_f), jnp.float32, -bound, bound)
        b = jax.random.uniform(kb, (out_f,), jnp.float32, -bound, bound)
        return w, b

    keys = jax.random.split(key, 2 + 3 * HEADS)
    wr, br = linear(keys[0], SEQ_LEN, EMBED_SIZE)
    wo, bo = linear(keys[1], EMBED_SIZE, HEADS * HEAD_DIM)
    wq, bq, wk, bk, wv, bv = [], [], [], [], [], []
    for i in range(HEADS):
        w, b = linear(keys[2 + 3 * i + 0], HEAD_DIM, HEAD_DIM); wq.append(w); bq.append(b)
        w, b = linear(keys[2 + 3 * i + 1], HEAD_DIM, HEAD_DIM); wk.append(w); bk.append(b)
        w, b = linear(keys[2 + 3 * i + 2], HEAD_DIM, HEAD_DIM); wv.append(w); bv.append(b)
    return {
        'wr': wr, 'br': br,
        'wq': jnp.stack(wq), 'bq': jnp.stack(bq),
        'wk': jnp.stack(wk), 'bk': jnp.stack(bk),
        'wv': jnp.stack(wv), 'bv': jnp.stack(bv),
        'wo': wo, 'bo': bo,
    }


def pack_params(p):
    """One-time host-side repack of the PyTorch-style weights for the kernel.

    * reduce_dim rows are permuted with sigma(t') = (t' % hd)*H + t'//hd so the
      per-(head,batch) attention output lands directly in the row order the
      module's raw (H,N,S,hd)->(N,S,H*hd) reshape expects.
    * per-head Wq/Wk/Wv are packed as block-diagonal (S,S) matrices so Q/K/V
      for all heads come from a single (N*S,S)@(S,S) dot each.
    * everything is concatenated into one weight slab + one bias slab so the
      kernel has only 3 operands (x + 2 slabs).
    """
    S, E, H, hd = SEQ_LEN, EMBED_SIZE, HEADS, HEAD_DIM
    perm = jnp.array([(t % hd) * H + t // hd for t in range(S)], dtype=jnp.int32)

    def block_diag_t(wstack):                       # (H, hd, hd) torch (out,in)
        m = jnp.zeros((S, S), jnp.float32)
        for h in range(H):
            m = m.at[h * hd:(h + 1) * hd, h * hd:(h + 1) * hd].set(wstack[h].T)
        return m

    w_slab = jnp.concatenate(
        [p['wr'][perm, :],                          # (S, E)
         block_diag_t(p['wq']),                     # (S, S)
         block_diag_t(p['wk']),                     # (S, S)
         block_diag_t(p['wv']),                     # (S, S)
         p['wo'].T],                                # (S, E)
        axis=1)                                     # (S, 2E + 3S) = (8, 88)

    b_slab = jnp.zeros((S, 2 * S + E), jnp.float32)          # (8, 48)
    b_slab = b_slab.at[:, 0].set(p['br'][perm])              # br as column
    b_slab = b_slab.at[0, S:2 * S].set(p['bq'].reshape(-1))  # all-head bq row
    b_slab = b_slab.at[1, S:2 * S].set(p['bk'].reshape(-1))
    b_slab = b_slab.at[2, S:2 * S].set(p['bv'].reshape(-1))
    b_slab = b_slab.at[0, 2 * S:2 * S + E].set(p['bo'])
    return {'w': w_slab, 'b': b_slab}


def reference_forward(x, params):
    """Pure-JAX mirror of the PyTorch forward (for correctness checking)."""
    n = x.shape[0]
    s, hd, h = SEQ_LEN, HEAD_DIM, HEADS
    reduced = jnp.einsum('te,nes->nts', params['wr'], x) + params['br'][None, :, None]
    outs = []
    for i in range(h):
        chunk = reduced[:, :, i * hd:(i + 1) * hd]
        q = jnp.einsum('ntc,dc->ntd', chunk, params['wq'][i]) + params['bq'][i]
        k = jnp.einsum('ntc,dc->ntd', chunk, params['wk'][i]) + params['bk'][i]
        v = jnp.einsum('ntc,dc->ntd', chunk, params['wv'][i]) + params['bv'][i]
        scores = jnp.einsum('ntd,nud->ntu', q, k)
        w = jax.nn.softmax(scores, axis=-1)
        outs.append(jnp.einsum('ntu,nud->ntd', w, v))
    out = jnp.stack(outs, axis=0).reshape(n, s, h * hd)
    return jnp.einsum('nsk,ek->nse', out, params['wo']) + params['bo']


if __name__ == "__main__":
    root = jax.random.PRNGKey(0)
    kx, kp = jax.random.split(root)
    x = jax.random.normal(kx, (N_BATCH, EMBED_SIZE, SEQ_LEN), jnp.float32)
    params = init_params(kp)
    packed = pack_params(params)   # one-time repack, not part of the forward path

    out = jax.block_until_ready(self_attention_forward(x, packed))
    ref = reference_forward(x, params)
    assert out.shape == (N_BATCH, SEQ_LEN, EMBED_SIZE), out.shape
    max_err = float(jnp.max(jnp.abs(out - ref)))
    # 1e-3 tolerance: the only approximation vs the f32 reference is the EUP
    # approximate reciprocal used for the softmax denominator.
    assert jnp.allclose(out, ref, rtol=1e-3, atol=1e-3), max_err
    print("KERNEL_OK")
</pallas_src>

<mosaic_0001>
module attributes {stable_mosaic.version = 11 : i64} {
  func.func @_fused_self_attention_kernel(%arg0: memref<2x32x8xf32, #tpu.memory_space<vmem>>, %arg1: memref<8x88xf32, #tpu.memory_space<vmem>>, %arg2: memref<8x48xf32, #tpu.memory_space<vmem>>, %arg3: memref<16x32xf32, #tpu.memory_space<vmem>>) attributes {dimension_semantics = [], scalar_prefetch = 0 : i64, scratch_operands = 0 : i64, tpu.core_type = #tpu.core_type<tc>} {
    %c0 = arith.constant 0 : index
    %c0_0 = arith.constant 0 : index
    %0 = vector.load %arg1[%c0, %c0_0] : memref<8x88xf32, #tpu.memory_space<vmem>>, vector<8x32xf32>
    %c0_1 = arith.constant 0 : index
    %c32 = arith.constant 32 : index
    %1 = vector.load %arg1[%c0_1, %c32] : memref<8x88xf32, #tpu.memory_space<vmem>>, vector<8x8xf32>
    %c0_2 = arith.constant 0 : index
    %c40 = arith.constant 40 : index
    %2 = vector.load %arg1[%c0_2, %c40] : memref<8x88xf32, #tpu.memory_space<vmem>>, vector<8x8xf32>
    %c0_3 = arith.constant 0 : index
    %c48 = arith.constant 48 : index
    %3 = vector.load %arg1[%c0_3, %c48] : memref<8x88xf32, #tpu.memory_space<vmem>>, vector<8x8xf32>
    %c0_4 = arith.constant 0 : index
    %c56 = arith.constant 56 : index
    %4 = vector.load %arg1[%c0_4, %c56] : memref<8x88xf32, #tpu.memory_space<vmem>>, vector<8x32xf32>
    %c0_5 = arith.constant 0 : index
    %c0_6 = arith.constant 0 : index
    %5 = vector.load %arg2[%c0_5, %c0_6] : memref<8x48xf32, #tpu.memory_space<vmem>>, vector<8x1xf32>
    %c0_7 = arith.constant 0 : index
    %c8 = arith.constant 8 : index
    %6 = vector.load %arg2[%c0_7, %c8] : memref<8x48xf32, #tpu.memory_space<vmem>>, vector<1x8xf32>
    %c1 = arith.constant 1 : index
    %c8_8 = arith.constant 8 : index
    %7 = vector.load %arg2[%c1, %c8_8] : memref<8x48xf32, #tpu.memory_space<vmem>>, vector<1x8xf32>
    %c2 = arith.constant 2 : index
    %c8_9 = arith.constant 8 : index
    %8 = vector.load %arg2[%c2, %c8_9] : memref<8x48xf32, #tpu.memory_space<vmem>>, vector<1x8xf32>
    %c0_10 = arith.constant 0 : index
    %c16 = arith.constant 16 : index
    %9 = vector.load %arg2[%c0_10, %c16] : memref<8x48xf32, #tpu.memory_space<vmem>>, vector<1x32xf32>
    %c0_11 = arith.constant 0 : index
    %c0_12 = arith.constant 0 : index
    %c0_13 = arith.constant 0 : index
    %10 = vector.load %arg0[%c0_11, %c0_12, %c0_13] : memref<2x32x8xf32, #tpu.memory_space<vmem>>, vector<1x32x8xf32>
    %11 = vector.shape_cast %10 : vector<1x32x8xf32> to vector<32x8xf32>
    %cst = arith.constant dense<0.000000e+00> : vector<8x8xf32>
    %12 = tpu.matmul %0, %11, %cst {dimension_numbers = #tpu.dot_dimension_numbers<[1], [0], [0], [1], [0, 0, 1, 1], [], []>} : vector<8x32xf32>, vector<32x8xf32>, vector<8x8xf32> -> vector<8x8xf32>
    %13 = vector.broadcast %5 : vector<8x1xf32> to vector<8x8xf32>
    %14 = arith.addf %12, %13 : vector<8x8xf32>
    %c1_14 = arith.constant 1 : index
    %c0_15 = arith.constant 0 : index
    %c0_16 = arith.constant 0 : index
    %15 = vector.load %arg0[%c1_14, %c0_15, %c0_16] : memref<2x32x8xf32, #tpu.memory_space<vmem>>, vector<1x32x8xf32>
    %16 = vector.shape_cast %15 : vector<1x32x8xf32> to vector<32x8xf32>
    %cst_17 = arith.constant dense<0.000000e+00> : vector<8x8xf32>
    %17 = tpu.matmul %0, %16, %cst_17 {dimension_numbers = #tpu.dot_dimension_numbers<[1], [0], [0], [1], [0, 0, 1, 1], [], []>} : vector<8x32xf32>, vector<32x8xf32>, vector<8x8xf32> -> vector<8x8xf32>
    %18 = vector.broadcast %5 : vector<8x1xf32> to vector<8x8xf32>
    %19 = arith.addf %17, %18 : vector<8x8xf32>
    %20 = tpu.concatenate %14, %19 in 0 : vector<8x8xf32>, vector<8x8xf32> -> vector<16x8xf32>
    %cst_18 = arith.constant dense<0.000000e+00> : vector<16x8xf32>
    %21 = tpu.matmul %20, %1, %cst_18 {dimension_numbers = #tpu.dot_dimension_numbers<[1], [0], [0], [1], [0, 0, 1, 1], [], []>} : vector<16x8xf32>, vector<8x8xf32>, vector<16x8xf32> -> vector<16x8xf32>
    %22 = vector.broadcast %6 : vector<1x8xf32> to vector<16x8xf32>
    %23 = arith.addf %21, %22 : vector<16x8xf32>
    %cst_19 = arith.constant dense<0.000000e+00> : vector<16x8xf32>
    %24 = tpu.matmul %20, %2, %cst_19 {dimension_numbers = #tpu.dot_dimension_numbers<[1], [0], [0], [1], [0, 0, 1, 1], [], []>} : vector<16x8xf32>, vector<8x8xf32>, vector<16x8xf32> -> vector<16x8xf32>
    %25 = vector.broadcast %7 : vector<1x8xf32> to vector<16x8xf32>
    %26 = arith.addf %24, %25 : vector<16x8xf32>
    %cst_20 = arith.constant dense<0.000000e+00> : vector<16x8xf32>
    %27 = tpu.matmul %20, %3, %cst_20 {dimension_numbers = #tpu.dot_dimension_numbers<[1], [0], [0], [1], [0, 0, 1, 1], [], []>} : vector<16x8xf32>, vector<8x8xf32>, vector<16x8xf32> -> vector<16x8xf32>
    %28 = vector.broadcast %8 : vector<1x8xf32> to vector<16x8xf32>
    %29 = arith.addf %27, %28 : vector<16x8xf32>
    %30 = vector.extract_strided_slice %23 {offsets = [0, 0], sizes = [8, 4], strides = [1, 1]} : vector<16x8xf32> to vector<8x4xf32>
    %31 = vector.extract_strided_slice %26 {offsets = [0, 0], sizes = [8, 4], strides = [1, 1]} : vector<16x8xf32> to vector<8x4xf32>
    %32 = vector.extract_strided_slice %29 {offsets = [0, 0], sizes = [8, 4], strides = [1, 1]} : vector<16x8xf32> to vector<8x4xf32>
    %cst_21 = arith.constant dense<0.000000e+00> : vector<8x8xf32>
    %33 = tpu.matmul %30, %31, %cst_21 {dimension_numbers = #tpu.dot_dimension_numbers<[1], [1], [0], [0], [0, 0, 1, 0], [], []>} : vector<8x4xf32>, vector<8x4xf32>, vector<8x8xf32> -> vector<8x8xf32>
    %cst_22 = arith.constant dense<0xFF800000> : vector<8xf32>
    %34 = vector.multi_reduction <maximumf>, %33, %cst_22 [1] : vector<8x8xf32> to vector<8xf32>
    %35 = vector.shape_cast %34 : vector<8xf32> to vector<8x1xf32>
    %36 = vector.broadcast %35 : vector<8x1xf32> to vector<8x8xf32>
    %37 = arith.subf %33, %36 : vector<8x8xf32>
    %38 = math.exp %37 : vector<8x8xf32>
    %cst_23 = arith.constant dense<0.000000e+00> : vector<8xf32>
    %39 = vector.multi_reduction <add>, %38, %cst_23 [1] : vector<8x8xf32> to vector<8xf32>
    %40 = vector.shape_cast %39 : vector<8xf32> to vector<8x1xf32>
    %41 = tpu.reciprocal %40 {approx = true} : vector<8x1xf32> -> vector<8x1xf32>
    %42 = vector.broadcast %41 : vector<8x1xf32> to vector<8x8xf32>
    %43 = arith.mulf %38, %42 : vector<8x8xf32>
    %cst_24 = arith.constant dense<0.000000e+00> : vector<8x4xf32>
    %44 = tpu.matmul %43, %32, %cst_24 {dimension_numbers = #tpu.dot_dimension_numbers<[1], [0], [0], [1], [0, 0, 1, 1], [], []>} : vector<8x8xf32>, vector<8x4xf32>, vector<8x4xf32> -> vector<8x4xf32>
    %45 = vector.extract_strided_slice %44 {offsets = [0, 0], sizes = [4, 4], strides = [1, 1]} : vector<8x4xf32> to vector<4x4xf32>
    %46 = vector.extract_strided_slice %4 {offsets = [0, 0], sizes = [4, 32], strides = [1, 1]} : vector<8x32xf32> to vector<4x32xf32>
    %cst_25 = arith.constant dense<0.000000e+00> : vector<4x32xf32>
    %47 = tpu.matmul %45, %46, %cst_25 {dimension_numbers = #tpu.dot_dimension_numbers<[1], [0], [0], [1], [0, 0, 1, 1], [], []>} : vector<4x4xf32>, vector<4x32xf32>, vector<4x32xf32> -> vector<4x32xf32>
    %48 = vector.broadcast %9 : vector<1x32xf32> to vector<4x32xf32>
    %49 = arith.addf %48, %47 : vector<4x32xf32>
    %50 = vector.extract_strided_slice %44 {offsets = [4, 0], sizes = [4, 4], strides = [1, 1]} : vector<8x4xf32> to vector<4x4xf32>
    %51 = vector.extract_strided_slice %4 {offsets = [4, 0], sizes = [4, 32], strides = [1, 1]} : vector<8x32xf32> to vector<4x32xf32>
    %cst_26 = arith.constant dense<0.000000e+00> : vector<4x32xf32>
    %52 = tpu.matmul %50, %51, %cst_26 {dimension_numbers = #tpu.dot_dimension_numbers<[1], [0], [0], [1], [0, 0, 1, 1], [], []>} : vector<4x4xf32>, vector<4x32xf32>, vector<4x32xf32> -> vector<4x32xf32>
    %53 = arith.addf %49, %52 : vector<4x32xf32>
    %c0_27 = arith.constant 0 : index
    %c0_28 = arith.constant 0 : index
    %54 = vector.load %arg3[%c0_27, %c0_28] : memref<16x32xf32, #tpu.memory_space<vmem>>, vector<4x32xf32>
    tpu.vector_store %arg3[%c0_27, %c0_28], %53 {strides = array<i32>} : memref<16x32xf32, #tpu.memory_space<vmem>>, vector<4x32xf32>,
    %55 = vector.extract_strided_slice %23 {offsets = [8, 0], sizes = [8, 4], strides = [1, 1]} : vector<16x8xf32> to vector<8x4xf32>
    %56 = vector.extract_strided_slice %26 {offsets = [8, 0], sizes = [8, 4], strides = [1, 1]} : vector<16x8xf32> to vector<8x4xf32>
    %57 = vector.extract_strided_slice %29 {offsets = [8, 0], sizes = [8, 4], strides = [1, 1]} : vector<16x8xf32> to vector<8x4xf32>
    %cst_29 = arith.constant dense<0.000000e+00> : vector<8x8xf32>
    %58 = tpu.matmul %55, %56, %cst_29 {dimension_numbers = #tpu.dot_dimension_numbers<[1], [1], [0], [0], [0, 0, 1, 0], [], []>} : vector<8x4xf32>, vector<8x4xf32>, vector<8x8xf32> -> vector<8x8xf32>
    %cst_30 = arith.constant dense<0xFF800000> : vector<8xf32>
    %59 = vector.multi_reduction <maximumf>, %58, %cst_30 [1] : vector<8x8xf32> to vector<8xf32>
    %60 = vector.shape_cast %59 : vector<8xf32> to vector<8x1xf32>
    %61 = vector.broadcast %60 : vector<8x1xf32> to vector<8x8xf32>
    %62 = arith.subf %58, %61 : vector<8x8xf32>
    %63 = math.exp %62 : vector<8x8xf32>
    %cst_31 = arith.constant dense<0.000000e+00> : vector<8xf32>
    %64 = vector.multi_reduction <add>, %63, %cst_31 [1] : vector<8x8xf32> to vector<8xf32>
    %65 = vector.shape_cast %64 : vector<8xf32> to vector<8x1xf32>
    %66 = tpu.reciprocal %65 {approx = true} : vector<8x1xf32> -> vector<8x1xf32>
    %67 = vector.broadcast %66 : vector<8x1xf32> to vector<8x8xf32>
    %68 = arith.mulf %63, %67 : vector<8x8xf32>
    %cst_32 = arith.constant dense<0.000000e+00> : vector<8x4xf32>
    %69 = tpu.matmul %68, %57, %cst_32 {dimension_numbers = #tpu.dot_dimension_numbers<[1], [0], [0], [1], [0, 0, 1, 1], [], []>} : vector<8x8xf32>, vector<8x4xf32>, vector<8x4xf32> -> vector<8x4xf32>
    %70 = vector.extract_strided_slice %69 {offsets = [0, 0], sizes = [4, 4], strides = [1, 1]} : vector<8x4xf32> to vector<4x4xf32>
    %71 = vector.extract_strided_slice %4 {offsets = [0, 0], sizes = [4, 32], strides = [1, 1]} : vector<8x32xf32> to vector<4x32xf32>
    %cst_33 = arith.constant dense<0.000000e+00> : vector<4x32xf32>
    %72 = tpu.matmul %70, %71, %cst_33 {dimension_numbers = #tpu.dot_dimension_numbers<[1], [0], [0], [1], [0, 0, 1, 1], [], []>} : vector<4x4xf32>, vector<4x32xf32>, vector<4x32xf32> -> vector<4x32xf32>
    %73 = vector.broadcast %9 : vector<1x32xf32> to vector<4x32xf32>
    %74 = arith.addf %73, %72 : vector<4x32xf32>
    %75 = vector.extract_strided_slice %69 {offsets = [4, 0], sizes = [4, 4], strides = [1, 1]} : vector<8x4xf32> to vector<4x4xf32>
    %76 = vector.extract_strided_slice %4 {offsets = [4, 0], sizes = [4, 32], strides = [1, 1]} : vector<8x32xf32> to vector<4x32xf32>
    %cst_34 = arith.constant dense<0.000000e+00> : vector<4x32xf32>
    %77 = tpu.matmul %75, %76, %cst_34 {dimension_numbers = #tpu.dot_dimension_numbers<[1], [0], [0], [1], [0, 0, 1, 1], [], []>} : vector<4x4xf32>, vector<4x32xf32>, vector<4x32xf32> -> vector<4x32xf32>
    %78 = arith.addf %74, %77 : vector<4x32xf32>
    %c4 = arith.constant 4 : index
    %c0_35 = arith.constant 0 : index
    %79 = vector.load %arg3[%c4, %c0_35] : memref<16x32xf32, #tpu.memory_space<vmem>>, vector<4x32xf32>
    tpu.vector_store %arg3[%c4, %c0_35], %78 {strides = array<i32>} : memref<16x32xf32, #tpu.memory_space<vmem>>, vector<4x32xf32>,
    %80 = vector.extract_strided_slice %23 {offsets = [0, 4], sizes = [8, 4], strides = [1, 1]} : vector<16x8xf32> to vector<8x4xf32>
    %81 = vector.extract_strided_slice %26 {offsets = [0, 4], sizes = [8, 4], strides = [1, 1]} : vector<16x8xf32> to vector<8x4xf32>
    %82 = vector.extract_strided_slice %29 {offsets = [0, 4], sizes = [8, 4], strides = [1, 1]} : vector<16x8xf32> to vector<8x4xf32>
    %cst_36 = arith.constant dense<0.000000e+00> : vector<8x8xf32>
    %83 = tpu.matmul %80, %81, %cst_36 {dimension_numbers = #tpu.dot_dimension_numbers<[1], [1], [0], [0], [0, 0, 1, 0], [], []>} : vector<8x4xf32>, vector<8x4xf32>, vector<8x8xf32> -> vector<8x8xf32>
    %cst_37 = arith.constant dense<0xFF800000> : vector<8xf32>
    %84 = vector.multi_reduction <maximumf>, %83, %cst_37 [1] : vector<8x8xf32> to vector<8xf32>
    %85 = vector.shape_cast %84 : vector<8xf32> to vector<8x1xf32>
    %86 = vector.broadcast %85 : vector<8x1xf32> to vector<8x8xf32>
    %87 = arith.subf %83, %86 : vector<8x8xf32>
    %88 = math.exp %87 : vector<8x8xf32>
    %cst_38 = arith.constant dense<0.000000e+00> : vector<8xf32>
    %89 = vector.multi_reduction <add>, %88, %cst_38 [1] : vector<8x8xf32> to vector<8xf32>
    %90 = vector.shape_cast %89 : vector<8xf32> to vector<8x1xf32>
    %91 = tpu.reciprocal %90 {approx = true} : vector<8x1xf32> -> vector<8x1xf32>
    %92 = vector.broadcast %91 : vector<8x1xf32> to vector<8x8xf32>
    %93 = arith.mulf %88, %92 : vector<8x8xf32>
    %cst_39 = arith.constant dense<0.000000e+00> : vector<8x4xf32>
    %94 = tpu.matmul %93, %82, %cst_39 {dimension_numbers = #tpu.dot_dimension_numbers<[1], [0], [0], [1], [0, 0, 1, 1], [], []>} : vector<8x8xf32>, vector<8x4xf32>, vector<8x4xf32> -> vector<8x4xf32>
    %95 = vector.extract_strided_slice %94 {offsets = [0, 0], sizes = [4, 4], strides = [1, 1]} : vector<8x4xf32> to vector<4x4xf32>
    %96 = vector.extract_strided_slice %4 {offsets = [0, 0], sizes = [4, 32], strides = [1, 1]} : vector<8x32xf32> to vector<4x32xf32>
    %cst_40 = arith.constant dense<0.000000e+00> : vector<4x32xf32>
    %97 = tpu.matmul %95, %96, %cst_40 {dimension_numbers = #tpu.dot_dimension_numbers<[1], [0], [0], [1], [0, 0, 1, 1], [], []>} : vector<4x4xf32>, vector<4x32xf32>, vector<4x32xf32> -> vector<4x32xf32>
    %98 = vector.broadcast %9 : vector<1x32xf32> to vector<4x32xf32>
    %99 = arith.addf %98, %97 : vector<4x32xf32>
    %100 = vector.extract_strided_slice %94 {offsets = [4, 0], sizes = [4, 4], strides = [1, 1]} : vector<8x4xf32> to vector<4x4xf32>
    %101 = vector.extract_strided_slice %4 {offsets = [4, 0], sizes = [4, 32], strides = [1, 1]} : vector<8x32xf32> to vector<4x32xf32>
    %cst_41 = arith.constant dense<0.000000e+00> : vector<4x32xf32>
    %102 = tpu.matmul %100, %101, %cst_41 {dimension_numbers = #tpu.dot_dimension_numbers<[1], [0], [0], [1], [0, 0, 1, 1], [], []>} : vector<4x4xf32>, vector<4x32xf32>, vector<4x32xf32> -> vector<4x32xf32>
    %103 = arith.addf %99, %102 : vector<4x32xf32>
    %c8_42 = arith.constant 8 : index
    %c0_43 = arith.constant 0 : index
    %104 = vector.load %arg3[%c8_42, %c0_43] : memref<16x32xf32, #tpu.memory_space<vmem>>, vector<4x32xf32>
    tpu.vector_store %arg3[%c8_42, %c0_43], %103 {strides = array<i32>} : memref<16x32xf32, #tpu.memory_space<vmem>>, vector<4x32xf32>,
    %105 = vector.extract_strided_slice %23 {offsets = [8, 4], sizes = [8, 4], strides = [1, 1]} : vector<16x8xf32> to vector<8x4xf32>
    %106 = vector.extract_strided_slice %26 {offsets = [8, 4], sizes = [8, 4], strides = [1, 1]} : vector<16x8xf32> to vector<8x4xf32>
    %107 = vector.extract_strided_slice %29 {offsets = [8, 4], sizes = [8, 4], strides = [1, 1]} : vector<16x8xf32> to vector<8x4xf32>
    %cst_44 = arith.constant dense<0.000000e+00> : vector<8x8xf32>
    %108 = tpu.matmul %105, %106, %cst_44 {dimension_numbers = #tpu.dot_dimension_numbers<[1], [1], [0], [0], [0, 0, 1, 0], [], []>} : vector<8x4xf32>, vector<8x4xf32>, vector<8x8xf32> -> vector<8x8xf32>
    %cst_45 = arith.constant dense<0xFF800000> : vector<8xf32>
    %109 = vector.multi_reduction <maximumf>, %108, %cst_45 [1] : vector<8x8xf32> to vector<8xf32>
    %110 = vector.shape_cast %109 : vector<8xf32> to vector<8x1xf32>
    %111 = vector.broadcast %110 : vector<8x1xf32> to vector<8x8xf32>
    %112 = arith.subf %108, %111 : vector<8x8xf32>
    %113 = math.exp %112 : vector<8x8xf32>
    %cst_46 = arith.constant dense<0.000000e+00> : vector<8xf32>
    %114 = vector.multi_reduction <add>, %113, %cst_46 [1] : vector<8x8xf32> to vector<8xf32>
    %115 = vector.shape_cast %114 : vector<8xf32> to vector<8x1xf32>
    %116 = tpu.reciprocal %115 {approx = true} : vector<8x1xf32> -> vector<8x1xf32>
    %117 = vector.broadcast %116 : vector<8x1xf32> to vector<8x8xf32>
    %118 = arith.mulf %113, %117 : vector<8x8xf32>
    %cst_47 = arith.constant dense<0.000000e+00> : vector<8x4xf32>
    %119 = tpu.matmul %118, %107, %cst_47 {dimension_numbers = #tpu.dot_dimension_numbers<[1], [0], [0], [1], [0, 0, 1, 1], [], []>} : vector<8x8xf32>, vector<8x4xf32>, vector<8x4xf32> -> vector<8x4xf32>
    %120 = vector.extract_strided_slice %119 {offsets = [0, 0], sizes = [4, 4], strides = [1, 1]} : vector<8x4xf32> to vector<4x4xf32>
    %121 = vector.extract_strided_slice %4 {offsets = [0, 0], sizes = [4, 32], strides = [1, 1]} : vector<8x32xf32> to vector<4x32xf32>
    %cst_48 = arith.constant dense<0.000000e+00> : vector<4x32xf32>
    %122 = tpu.matmul %120, %121, %cst_48 {dimension_numbers = #tpu.dot_dimension_numbers<[1], [0], [0], [1], [0, 0, 1, 1], [], []>} : vector<4x4xf32>, vector<4x32xf32>, vector<4x32xf32> -> vector<4x32xf32>
    %123 = vector.broadcast %9 : vector<1x32xf32> to vector<4x32xf32>
    %124 = arith.addf %123, %122 : vector<4x32xf32>
    %125 = vector.extract_strided_slice %119 {offsets = [4, 0], sizes = [4, 4], strides = [1, 1]} : vector<8x4xf32> to vector<4x4xf32>
    %126 = vector.extract_strided_slice %4 {offsets = [4, 0], sizes = [4, 32], strides = [1, 1]} : vector<8x32xf32> to vector<4x32xf32>
    %cst_49 = arith.constant dense<0.000000e+00> : vector<4x32xf32>
    %127 = tpu.matmul %125, %126, %cst_49 {dimension_numbers = #tpu.dot_dimension_numbers<[1], [0], [0], [1], [0, 0, 1, 1], [], []>} : vector<4x4xf32>, vector<4x32xf32>, vector<4x32xf32> -> vector<4x32xf32>
    %128 = arith.addf %124, %127 : vector<4x32xf32>
    %c12 = arith.constant 12 : index
    %c0_50 = arith.constant 0 : index
    %129 = vector.load %arg3[%c12, %c0_50] : memref<16x32xf32, #tpu.memory_space<vmem>>, vector<4x32xf32>
    tpu.vector_store %arg3[%c12, %c0_50], %128 {strides = array<i32>} : memref<16x32xf32, #tpu.memory_space<vmem>>, vector<4x32xf32>,
    return
  }
}

</mosaic_0001>

<bundles_post_ra>
// kernel: self_attention_forward.1
= control target key start
LH: loop header
LB: loop body
LE: loop exit
PB: predicated region body
PF: predicated region fallthrough
CT: control target
= control target key end

     0   :  { %v2031_v2 = vmov 0.0   ;;  %s2294_s0 = inlined_call_operand.vmem [shape: f32[2,32,8], index: 0, kind: input, shape index: {}]   ;;  %s2295_s1 = inlined_call_operand.vmem [shape: f32[8,88], index: 1, kind: input, shape index: {}]   ;;  %s2296_s2 = inlined_call_operand.vmem [shape: f32[8,48], index: 2, kind: input, shape index: {}]   ;;  %s2297_s3 = inlined_call_operand.hbm [shape: f32[16,32], index: 3, kind: output, shape index: {}]  }
   0x1   :  { %v23_v0 = vld [vmem:[%s2294_s0 + $0x18] sm:$0xff]  ;;  %1861 = vmatprep.subr.mxu0 %v2031_v2  ;;  %1872 = vmatprep.subr.mxu1 %v2031_v2  ;;  %v22_v3 = vld [vmem:[%s2294_s0 + $0x10] sm:$0xff]  ;;  %v21_v5 = vld [vmem:[%s2294_s0 + $0x8] sm:$0xff] }
   0x2   :  { %v1771_v1 = vld [vmem:[%s2294_s0 + $0x38] sm:$0xff]  ;;  %v1770_v4 = vld [vmem:[%s2294_s0 + $0x30] sm:$0xff]  ;;  %1862 = vmatpush3.msra.mxu0 %v23_v0  ;;  %v1769_v6 = vld [vmem:[%s2294_s0 + $0x28] sm:$0xff] }
   0x3   :  { %1873 = vmatpush3.msra.mxu1 %v1771_v1  ;;  %1863 = vmatprep.subr.mxu0 %v2031_v2 }
   0x4   :  { %1874 = vmatprep.subr.mxu1 %v2031_v2 }
   0x5   :  { %8 = vsyncpa [#allocation3], 0  ;;  %1864 = vmatpush3.msra.mxu0 %v22_v3  ;;  %1875 = vmatpush3.msra.mxu1 %v1770_v4  ;;  %v20_v7 = vld [vmem:[%s2294_s0] sm:$0xff]  ;;  %vm29_vm0 = vcmask 261120   ;;  %vm2032_vm1 = vmmov 0   ;;  %v2033_v11 = vmov 0  }
   0x6   :  { %1865 = vmatprep.subr.mxu0 %v2031_v2  ;;  %1876 = vmatprep.subr.mxu1 %v2031_v2  ;;  %v1768_v8 = vld [vmem:[%s2294_s0 + $0x20] sm:$0xff]  ;;  %s2035_s6 = smov 120   ;;  %s2036_s7 = smov 88   ;;  %vm189_vm2 = vcmask 64512   ;;  %vm443_vm3 = vcmask 31744   ;;  %vm609_vm4 = vcmask 1043456  }
   0x7   :  { %1866 = vmatpush3.msra.mxu0 %v21_v5  ;;  %1877 = vmatpush3.msra.mxu1 %v1769_v6  ;;  %v2100_v9 = vld [vmem:[%s2295_s1] sm:$0xff]  ;;  %s2034_s1 = smov 96   ;;  %s2037_s8 = smov 80   ;;  %vm774_vm5 = vcmask 257024  }
   0x8   :  { %1867 = vmatprep.subr.mxu0 %v2031_v2  ;;  %1878 = vmatprep.subr.mxu1 %v2031_v2  ;;  %v16_v10 = vld [vmem:[%s2296_s2] sm:$0xff]  ;;  %v688_v58 = vrot.slane %v2100_v9, 4  ;;  %s2039_s13 = smov 124   ;;  %s2040_s14 = smov 16  }
   0x9   :  { %1868 = vmatpush3.msra.mxu0 %v20_v7  ;;  %1869 = vmatprep.mubr.msk.f32.mxu0 %vm2032_vm1, %v2031_v2  ;;  %v1776_v12 = vld [vmem:[%s2296_s2 + $0x1] ss:$0 sm:$0xff]  ;;  %v2121_v13 = vld [vmem:[%s2296_s2] ss:$0 sm:$0xff]  ;;  %v1779_v35 = vld [vmem:[%s2296_s2 + $0x2] ss:$0 sm:$0xff] }
   0xa   :  { %1879 = vmatpush3.msra.mxu1 %v1768_v8  ;;  %1880 = vmatprep.mubr.msk.f32.mxu1 %vm2032_vm1, %v2031_v2  ;;  %s2038_s2 = smov 72   ;;  %s2041_s15 = smov 112  }
   0xb   :  { %1870 = vmatmul.mubr.msk.f32.vlgmr.msra.gmra.mxu0 %vm29_vm0, %v2100_v9  ;;  %1881 = vmatmul.mubr.msk.f32.vlgmr.msra.gmra.mxu1 %vm29_vm0, %v2100_v9  ;;  %s2042_s16 = smov [#allocation2]  }
   0xc   :  { %1992 = vset.pattern.permute.xlu0 %v2033_v11  ;;  %182 = vrot.lane.b32.xlu1 %v2100_v9, %s2034_s1  ;;  %s1756_s17 = sshll.u32 %s2042_s16, 4  ;;  %s1757_s17 = int_to_ptr.vmem [resolvable:$true] %s1756_s17 }
   0xd   :  { %26 = vperm.xlu0 %1992, %v16_v10   ;;  %s2009_s18 = scalar_lea.vmem %s1757_s17, 256  ;;  %p2014_p1 = scmp.lt.s32.totalorder %s1757_s17, %s1757_s17 }
   0xe   :  { %p2010_p0 = scmp.ne.s32.totalorder %s1757_s17, %s2009_s18  ;;  %p2015_p2 = scmp.lt.s32.totalorder %s2009_s18, %s2009_s18 }
  0x10   :  { %279 = vrot.lane.b32.xlu1 %v1776_v12, %s2035_s6  ;;  %p2016_p3 = por %p2015_p2, %p2014_p1 }
  0x11   :  { %275 = vrot.lane.b32.xlu0 %v2100_v9, %s2036_s7 }
  0x12   :  { %p2017_p4 = pnand %p2016_p3, %p2010_p0 }
  0x14   :  { %361 = vrot.lane.b32.xlu1 %v2100_v9, %s2037_s8 }
  0x15   :  { %186 = vrot.lane.b32.xlu0 %v2121_v13, %s2035_s6 }
  0x7e   :  { %v183_v14 = vpop.permute.xlu1 %182 }
  0x7f   :  { %1883 = vmatprep.subr.mxu0 %v183_v14 }
  0x80   :  { %1884 = vmatpush3.msra.mxu0 %v183_v14 }
  0x82   :  { %v2125_v15 = vpop.permute.xlu1 %279 }
  0x86   :  { %v362_v16 = vpop.permute.xlu1 %361 }
  0x87   :  { %1893 = vmatprep.subr.mxu0 %v362_v16 }
  0x88   :  { %v27_v17 = vpop.permute.xlu0 %26 }
  0x8c   :  { %v276_v18 = vpop.permute.xlu0 %275 }
  0x8d   :  { %1888 = vmatprep.subr.mxu1 %v276_v18 }
  0x8e   :  { %1889 = vmatpush3.msra.mxu1 %v276_v18 }
  0x8f   :  { %1898 = vmatprep.subr.mxu1 %v2031_v2 }
  0x90   :  { %v187_v30 = vpop.permute.xlu0 %186 }
  0xcb   :  { %v99_v19 = vpop.f32.mrf.mxu0  ;;  %v174_v20 = vpop.f32.mrf.mxu1 }
  0xcc   :  { %v100_v21 = vadd.f32 %v99_v19, %v27_v17  ;;  %v175_v22 = vadd.f32 %v174_v20, %v27_v17 }
  0xcd   :  { %v1871_v23 = vpop.f32.mrf.mxu0  ;;  %v1882_v24 = vpop.f32.mrf.mxu1 }
  0xce   :  { %1885 = vmatprep.mubr.msk.f32.mxu0 %vm189_vm2, %v100_v21  ;;  %1890 = vmatprep.mubr.msk.f32.mxu1 %vm189_vm2, %v100_v21 }
  0xcf   :  { %1886 = vmatmul.mubr.msk.f32.vlgmr.msra.gmra.mxu0 %vm189_vm2, %v175_v22  ;;  %1891 = vmatmul.mubr.msk.f32.vlgmr.msra.gmra.mxu1 %vm189_vm2, %v175_v22 }
  0xd0   :  { %1895 = vmatprep.mubr.msk.f32.mxu0 %vm189_vm2, %v100_v21  ;;  %1894 = vmatpush3.msra.mxu0 %v362_v16 }
  0xd1   :  { %1900 = vmatprep.mubr.msk.f32.mxu1 %vm2032_vm1, %v2031_v2  ;;  %1903 = vmatprep.subr.mxu0 %v2031_v2 }
  0xd3   :  { %1896 = vmatmul.mubr.msk.f32.vlgmr.msra.gmra.mxu0 %vm189_vm2, %v175_v22 }
  0xd4   :  { %1905 = vmatprep.mubr.msk.f32.mxu0 %vm2032_vm1, %v2031_v2 }
 0x18f   :  { %v1887_v25 = vpop.f32.mrf.mxu0  ;;  %v1892_v26 = vpop.f32.mrf.mxu1 }
 0x190   :  { %v2169_v49 = vadd.f32 %v1892_v26, %v2125_v15  ;;  %v2176_v52 = vadd.f32 %v1887_v25, %v187_v30 }
 0x191   :  { %v348_v27 = vpop.f32.mrf.mxu1  ;;  %v262_v28 = vpop.f32.mrf.mxu0 }
 0x192   :  { %v2140_v29 = vadd.f32 %v348_v27, %v2125_v15  ;;  %v263_v31 = vadd.f32 %v262_v28, %v187_v30 }
 0x193   :  { %v1897_v36 = vpop.f32.mrf.mxu0 }
 0x194   :  { %1899 = vmatpush3.xpose.msk.msra.mxu1 %vm443_vm3, %v2140_v29 }
 0x195   :  { %1908 = vmatprep.subr.mxu1 %v2031_v2  ;;  %v434_v40 = vpop.f32.mrf.mxu0 }
 0x197   :  { %1901 = vmatmul.mubr.msk.f32.vlgmr.msra.gmra.mxu1 %vm443_vm3, %v263_v31 }
 0x198   :  { %1910 = vmatprep.mubr.msk.f32.mxu1 %vm2032_vm1, %v2031_v2 }
 0x257   :  { %v516_v32 = vpop.f32.mrf.mxu1 }
 0x258   :  { %v520_v33 = vsel %vm189_vm2, %v516_v32, -inf }
 0x259   :  { %521 = vmax.xlane.f32.xlu0 %v520_v33  ;;  %v1902_v34 = vpop.f32.mrf.mxu1 }
 0x26f   :  { %365 = vrot.lane.b32.xlu0 %v1779_v35, %s2035_s6 }
 0x2e2   :  { %v522_v37 = vpop.xlane.xlu0 %521 }
 0x2e3   :  { %v523_v38 = vsub.f32 %v516_v32, %v522_v37 }
 0x2e5   :  { %v524_v39 = vmul.f32 1.442695, %v523_v38 }
 0x2e6   :  { %v366_v41 = vpop.permute.xlu0 %365 }
 0x2e7   :  { %1993 = vpow2.f32 %v524_v39  ;;  %v2153_v42 = vadd.f32 %v434_v40, %v366_v41  ;;  %v2194_v0 = vadd.f32 %v1897_v36, %v366_v41 }
 0x2e9   :  { %1904 = vmatpush3.msra.mxu0 %v2153_v42 }
 0x2ea   :  { %1913 = vmatprep.subr.mxu0 %v2031_v2 }
 0x2f4   :  { %v1994_v43 = vpop.eup %1993 }
 0x2f5   :  { %v526_v44 = vsel %vm189_vm2, %v1994_v43, 0.0 }
 0x2f6   :  { %527 = vadd.xlane.f32.xlu1 %v526_v44 }
 0x307   :  { %604 = vrot.lane.b32.xlu1 %v2100_v9, %s2038_s2 }
 0x37f   :  { %v528_v45 = vpop.xlane.xlu1 %527 }
 0x380   :  { %1995 = vrcp.f32 %v528_v45 }
 0x383   :  { %v2160_v46 = vpop.permute.xlu1 %604 }
 0x384   :  { %1909 = vmatpush3.msk.msra.mxu1 %vm609_vm4, %v2160_v46 }
 0x385   :  { %1918 = vmatprep.subr.mxu1 %v2031_v2 }
 0x38d   :  { %v1996_v47 = vpop.eup %1995 }
 0x38e   :  { %v530_v48 = vmul.f32 %v1996_v47, %v1994_v43 }
 0x390   :  { %1906 = vmatmul.mubr.msk.f32.vlgmr.msra.gmra.mxu0 %vm189_vm2, %v530_v48 }
 0x391   :  { %1915 = vmatprep.mubr.msk.f32.mxu0 %vm2032_vm1, %v2031_v2 }
 0x450   :  { %v600_v50 = vpop.f32.mrf.mxu0 }
 0x451   :  { %1911 = vmatmul.mubr.msk.f32.vlgmr.msra.gmra.mxu1 %vm443_vm3, %v600_v50  ;;  %v687_v62 = vrot.slane %v600_v50, 4 }
 0x452   :  { %1919 = vmatpush3.xpose.msk.msra.mxu1 %vm443_vm3, %v2169_v49  ;;  %v1907_v51 = vpop.f32.mrf.mxu0  ;;  %1920 = vmatprep.mubr.msk.f32.mxu1 %vm2032_vm1, %v2031_v2 }
 0x453   :  { %1928 = vmatprep.subr.mxu1 %v2031_v2 }
 0x455   :  { %1921 = vmatmul.mubr.msk.f32.vlgmr.msra.gmra.mxu1 %vm443_vm3, %v2176_v52 }
 0x456   :  { %1929 = vmatpush3.msk.msra.mxu1 %vm609_vm4, %v2160_v46  ;;  %1930 = vmatprep.mubr.msk.f32.mxu1 %vm2032_vm1, %v2031_v2 }
 0x457   :  { %1938 = vmatprep.subr.mxu1 %v2031_v2 }
 0x511   :  { %v2186_v53 = vpop.f32.mrf.mxu1 }
 0x513   :  { %v1912_v54 = vpop.f32.mrf.mxu1 }
 0x515   :  { %v848_v55 = vpop.f32.mrf.mxu1 }
 0x516   :  { %v852_v56 = vsel %vm189_vm2, %v848_v55, -inf }
 0x517   :  { %853 = vmax.xlane.f32.xlu0 %v852_v56  ;;  %v1922_v57 = vpop.f32.mrf.mxu1 }
 0x52d   :  { %689 = vrot.lane.b32.xlu0 %v688_v58, %s2038_s2 }
 0x531   :  { %1097 = vrot.lane.b32.xlu0 %v263_v31, %s2039_s13 }
 0x5a0   :  { %v854_v59 = vpop.xlane.xlu0 %853 }
 0x5a1   :  { %v855_v60 = vsub.f32 %v848_v55, %v854_v59 }
 0x5a3   :  { %v856_v61 = vmul.f32 1.442695, %v855_v60 }
 0x5a4   :  { %v2192_v63 = vpop.permute.xlu0 %689 }
 0x5a5   :  { %1997 = vpow2.f32 %v856_v61  ;;  %1914 = vmatpush3.msk.msra.mxu0 %vm609_vm4, %v2192_v63 }
 0x5a6   :  { %1916 = vmatmul.mubr.msk.f32.vlgmr.msra.gmra.mxu0 %vm443_vm3, %v687_v62  ;;  %1923 = vmatprep.subr.mxu0 %v2031_v2 }
 0x5a7   :  { %1924 = vmatpush3.msra.mxu0 %v2194_v0  ;;  %1925 = vmatprep.mubr.msk.f32.mxu0 %vm2032_vm1, %v2031_v2 }
 0x5a8   :  { %1933 = vmatprep.subr.mxu0 %v2031_v2  ;;  %v1098_v14 = vpop.permute.xlu0 %1097 }
 0x5b2   :  { %v1998_v1 = vpop.eup %1997 }
 0x5b3   :  { %v858_v3 = vsel %vm189_vm2, %v1998_v1, 0.0 }
 0x5b4   :  { %859 = vadd.xlane.f32.xlu1 %v858_v3 }
 0x5c5   :  { %1099 = vrot.lane.b32.xlu1 %v2140_v29, %s2039_s13 }
 0x63d   :  { %v860_v4 = vpop.xlane.xlu1 %859 }
 0x63e   :  { %1999 = vrcp.f32 %v860_v4 }
 0x641   :  { %v1100_v10 = vpop.permute.xlu1 %1099 }
 0x64b   :  { %v2000_v5 = vpop.eup %1999 }
 0x64c   :  { %v862_v6 = vmul.f32 %v2000_v5, %v1998_v1 }
 0x64e   :  { %1926 = vmatmul.mubr.msk.f32.vlgmr.msra.gmra.mxu0 %vm189_vm2, %v862_v6 }
 0x64f   :  { %1934 = vmatpush3.msk.msra.mxu0 %vm609_vm4, %v2192_v63  ;;  %1935 = vmatprep.mubr.msk.f32.mxu0 %vm2032_vm1, %v2031_v2 }
 0x650   :  { %1943 = vmatprep.subr.mxu0 %v2031_v2 }
 0x666   :  { %v2213_v7 = vpop.f32.mrf.mxu0 }
 0x668   :  { %v1917_v8 = vpop.f32.mrf.mxu0 }
 0x70e   :  { %v932_v9 = vpop.f32.mrf.mxu0 }
 0x70f   :  { %v1014_v11 = vrot.slane %v932_v9, 4  ;;  %1931 = vmatmul.mubr.msk.f32.vlgmr.msra.gmra.mxu1 %vm443_vm3, %v932_v9 }
 0x710   :  { %1939 = vmatpush3.xpose.msk.msra.mxu1 %vm443_vm3, %v1100_v10  ;;  %v1927_v12 = vpop.f32.mrf.mxu0  ;;  %1940 = vmatprep.mubr.msk.f32.mxu1 %vm2032_vm1, %v2031_v2 }
 0x711   :  { %1936 = vmatmul.mubr.msk.f32.vlgmr.msra.gmra.mxu0 %vm443_vm3, %v1014_v11  ;;  %1948 = vmatprep.subr.mxu1 %v2031_v2 }
 0x712   :  { %1945 = vmatprep.mubr.msk.f32.mxu0 %vm2032_vm1, %v2031_v2 }
 0x713   :  { %1941 = vmatmul.mubr.msk.f32.vlgmr.msra.gmra.mxu1 %vm443_vm3, %v1098_v14 }
 0x714   :  { %1949 = vmatpush3.msk.msra.mxu1 %vm609_vm4, %v2160_v46  ;;  %1950 = vmatprep.mubr.msk.f32.mxu1 %vm2032_vm1, %v2031_v2 }
 0x715   :  { %1958 = vmatprep.subr.mxu1 %v2031_v2 }
 0x7cf   :  { %v1005_v15 = vpop.f32.mrf.mxu1 }
 0x7d1   :  { %v1932_v16 = vpop.f32.mrf.mxu1  ;;  %v1083_v17 = vpop.f32.mrf.mxu0 }
 0x7d3   :  { %v1937_v18 = vpop.f32.mrf.mxu0  ;;  %v1171_v19 = vpop.f32.mrf.mxu1 }
 0x7d4   :  { %v1175_v20 = vsel %vm189_vm2, %v1171_v19, -inf }
 0x7d5   :  { %1176 = vmax.xlane.f32.xlu1 %v1175_v20  ;;  %v1942_v21 = vpop.f32.mrf.mxu1 }
 0x7e6   :  { %1426 = vrot.lane.b32.xlu1 %v2169_v49, %s2039_s13 }
 0x7ea   :  { %1424 = vrot.lane.b32.xlu1 %v2176_v52, %s2039_s13 }
 0x85e   :  { %v1177_v22 = vpop.xlane.xlu1 %1176 }
 0x85f   :  { %v1178_v23 = vsub.f32 %v1171_v19, %v1177_v22 }
 0x861   :  { %v1179_v24 = vmul.f32 1.442695, %v1178_v23 }
 0x862   :  { %v1427_v31 = vpop.permute.xlu1 %1426 }
 0x863   :  { %2001 = vpow2.f32 %v1179_v24 }
 0x866   :  { %v1425_v35 = vpop.permute.xlu1 %1424 }
 0x870   :  { %v2002_v25 = vpop.eup %2001 }
 0x871   :  { %v1181_v26 = vsel %vm189_vm2, %v2002_v25, 0.0 }
 0x872   :  { %1182 = vadd.xlane.f32.xlu0 %v1181_v26 }
 0x888   :  { %1187 = vrot.lane.b32.xlu0 %v2153_v42, %s2039_s13 }
 0x8fb   :  { %v1183_v27 = vpop.xlane.xlu0 %1182 }
 0x8fc   :  { %2003 = vrcp.f32 %v1183_v27 }
 0x8ff   :  { %v1188_v28 = vpop.permute.xlu0 %1187 }
 0x900   :  { %1944 = vmatpush3.msra.mxu0 %v1188_v28 }
 0x901   :  { %1953 = vmatprep.subr.mxu0 %v2031_v2 }
 0x909   :  { %v2004_v29 = vpop.eup %2003 }
 0x90a   :  { %v1185_v30 = vmul.f32 %v2004_v29, %v2002_v25 }
 0x90c   :  { %1946 = vmatmul.mubr.msk.f32.vlgmr.msra.gmra.mxu0 %vm189_vm2, %v1185_v30 }
 0x90d   :  { %1954 = vmatpush3.msk.msra.mxu0 %vm609_vm4, %v2192_v63  ;;  %1955 = vmatprep.mubr.msk.f32.mxu0 %vm2032_vm1, %v2031_v2 }
 0x90e   :  { %1963 = vmatprep.subr.mxu0 %v2031_v2 }
 0x9cc   :  { %v1259_v32 = vpop.f32.mrf.mxu0 }
 0x9cd   :  { %v1341_v33 = vrot.slane %v1259_v32, 4  ;;  %1951 = vmatmul.mubr.msk.f32.vlgmr.msra.gmra.mxu1 %vm443_vm3, %v1259_v32 }
 0x9ce   :  { %1959 = vmatpush3.xpose.msk.msra.mxu1 %vm443_vm3, %v1427_v31  ;;  %v1947_v34 = vpop.f32.mrf.mxu0  ;;  %1960 = vmatprep.mubr.msk.f32.mxu1 %vm2032_vm1, %v2031_v2 }
 0x9cf   :  { %1956 = vmatmul.mubr.msk.f32.vlgmr.msra.gmra.mxu0 %vm443_vm3, %v1341_v33  ;;  %1968 = vmatprep.subr.mxu1 %v2031_v2 }
 0x9d0   :  { %1965 = vmatprep.mubr.msk.f32.mxu0 %vm2032_vm1, %v2031_v2 }
 0x9d1   :  { %1961 = vmatmul.mubr.msk.f32.vlgmr.msra.gmra.mxu1 %vm443_vm3, %v1425_v35 }
 0x9d2   :  { %1969 = vmatpush3.msk.msra.mxu1 %vm609_vm4, %v2160_v46  ;;  %1970 = vmatprep.mubr.msk.f32.mxu1 %vm2032_vm1, %v2031_v2 }
 0xa8d   :  { %v1332_v36 = vpop.f32.mrf.mxu1 }
 0xa8f   :  { %v1952_v37 = vpop.f32.mrf.mxu1  ;;  %v1410_v38 = vpop.f32.mrf.mxu0 }
 0xa91   :  { %v1957_v39 = vpop.f32.mrf.mxu0  ;;  %v1498_v40 = vpop.f32.mrf.mxu1 }
 0xa92   :  { %v1502_v41 = vsel %vm189_vm2, %v1498_v40, -inf }
 0xa93   :  { %1503 = vmax.xlane.f32.xlu0 %v1502_v41  ;;  %v1962_v42 = vpop.f32.mrf.mxu1 }
 0xaa9   :  { %1514 = vrot.lane.b32.xlu0 %v2194_v0, %s2039_s13 }
 0xaad   :  { %1010 = vrot.lane.b32.xlu0 %v1005_v15, %s2040_s14 }
 0xab1   :  { %1088 = vrot.lane.b32.xlu0 %v1083_v17, %s2040_s14 }
 0xb1c   :  { %v1504_v43 = vpop.xlane.xlu0 %1503 }
 0xb1d   :  { %v1505_v44 = vsub.f32 %v1498_v40, %v1504_v43 }
 0xb1f   :  { %v1506_v45 = vmul.f32 1.442695, %v1505_v44 }
 0xb20   :  { %v1515_v46 = vpop.permute.xlu0 %1514 }
 0xb21   :  { %2005 = vpow2.f32 %v1506_v45  ;;  %1964 = vmatpush3.msra.mxu0 %v1515_v46 }
 0xb22   :  { %1973 = vmatprep.subr.mxu0 %v2031_v2 }
 0xb2e   :  { %v2006_v47 = vpop.eup %2005 }
 0xb2f   :  { %v1508_v48 = vsel %vm189_vm2, %v2006_v47, 0.0 }
 0xb30   :  { %1509 = vadd.xlane.f32.xlu1 %v1508_v48 }
 0xb41   :  { %683 = vrot.lane.b32.xlu1 %v2186_v53, %s2040_s14 }
 0xb45   :  { %1337 = vrot.lane.b32.xlu1 %v1332_v36, %s2040_s14 }
 0xb49   :  { %766 = vrot.lane.b32.xlu1 %v2213_v7, %s2040_s14 }
 0xb4d   :  { %1415 = vrot.lane.b32.xlu1 %v1410_v38, %s2040_s14 }
 0xbb9   :  { %v1510_v49 = vpop.xlane.xlu1 %1509 }
 0xbba   :  { %2007 = vrcp.f32 %v1510_v49 }
 0xbbd   :  { %v684_v50 = vpop.permute.xlu1 %683 }
 0xbbe   :  { %v686_v52 = vadd.f32 %v2121_v13, %v684_v50 }
 0xbc1   :  { %v1338_v51 = vpop.permute.xlu1 %1337 }
 0xbc2   :  { %v1340_v57 = vadd.f32 %v2121_v13, %v1338_v51 }
 0xbc5   :  { %v767_v54 = vpop.permute.xlu1 %766 }
 0xbc6   :  { %v769_v55 = vadd.f32 %v767_v54, %v686_v52 }
 0xbc7   :  { %v2008_v56 = vpop.eup %2007 }
 0xbc8   :  { %771 = vrot.lane.b32.xlu1 %v769_v55, %s2041_s15  ;;  %v1512_v53 = vmul.f32 %v2008_v56, %v2006_v47 }
 0xbc9   :  { %v1416_v58 = vpop.permute.xlu1 %1415 }
 0xbca   :  { %v1418_v59 = vadd.f32 %v1416_v58, %v1340_v57  ;;  %1966 = vmatmul.mubr.msk.f32.vlgmr.msra.gmra.mxu0 %vm189_vm2, %v1512_v53 }
 0xbcb   :  { %1974 = vmatpush3.msk.msra.mxu0 %vm609_vm4, %v2192_v63  ;;  %1975 = vmatprep.mubr.msk.f32.mxu0 %vm2032_vm1, %v2031_v2  ;;  %v1011_v63 = vpop.permute.xlu0 %1010 }
 0xbcc   :  { %1420 = vrot.lane.b32.xlu1 %v1418_v59, %s2041_s15  ;;  %v1013_v7 = vadd.f32 %v2121_v13, %v1011_v63 }
 0xbcf   :  { %v1089_v5 = vpop.permute.xlu0 %1088 }
 0xbd0   :  { %v1091_v8 = vadd.f32 %v1089_v5, %v1013_v7 }
 0xc3a   :  { %v772_v60 = vpop.permute.xlu1 %771 }
 0xc3b   :  { %775 = vst.msk [vmem:[#allocation2] sm:$0xf] %vm774_vm5, %v772_v60 }
 0xc3e   :  { %v1421_v61 = vpop.permute.xlu1 %1420 }
 0xc3f   :  { %1423 = vst.msk [vmem:[#allocation2 + $0x8] sm:$0xf] %vm774_vm5, %v1421_v61 }
 0xc8a   :  { %v1586_v62 = vpop.f32.mrf.mxu0 }
 0xc8b   :  { %v1668_v0 = vrot.slane %v1586_v62, 4  ;;  %1971 = vmatmul.mubr.msk.f32.vlgmr.msra.gmra.mxu1 %vm443_vm3, %v1586_v62 }
 0xc8c   :  { %v1967_v1 = vpop.f32.mrf.mxu0 }
 0xc8d   :  { %1976 = vmatmul.mubr.msk.f32.vlgmr.msra.gmra.mxu0 %vm443_vm3, %v1668_v0 }
 0xd4b   :  { %v1659_v3 = vpop.f32.mrf.mxu1 }
 0xd4c   :  { %1664 = vrot.lane.b32.xlu0 %v1659_v3, %s2040_s14 }
 0xd4d   :  { %v1972_v2 = vpop.f32.mrf.mxu1  ;;  %v1737_v4 = vpop.f32.mrf.mxu0 }
 0xd4f   :  { %v1977_v6 = vpop.f32.mrf.mxu0 }
 0xd50   :  { %1742 = vrot.lane.b32.xlu0 %v1737_v4, %s2040_s14 }
 0xd54   :  { %1093 = vrot.lane.b32.xlu0 %v1091_v8, %s2041_s15 }
 0xdbe   :  { %v1665_v9 = vpop.permute.xlu0 %1664 }
 0xdbf   :  { %v1667_v10 = vadd.f32 %v2121_v13, %v1665_v9 }
 0xdc2   :  { %v1743_v11 = vpop.permute.xlu0 %1742 }
 0xdc3   :  { %v1745_v12 = vadd.f32 %v1743_v11, %v1667_v10 }
 0xdc5   :  { %1747 = vrot.lane.b32.xlu0 %v1745_v12, %s2041_s15 }
 0xdc6   :  { %v1094_v14 = vpop.permute.xlu0 %1093 }
 0xdc7   :  { %1096 = vst.msk [vmem:[#allocation2 + $0x4] sm:$0xf] %vm774_vm5, %v1094_v14 }
 0xe37   :  { %v1748_v15 = vpop.permute.xlu0 %1747 }
 0xe38   :  { %1750 = vst.msk [vmem:[#allocation2 + $0xc] sm:$0xf] %vm774_vm5, %v1748_v15 }
 0xe39   :  { %2020 = shalt.err (!%p2017_p4)
}
 0xe3a   :  { %s2043_s19 = smov 128   ;;  %s2044_s20 = smov 8  }
 0xe3b   :  { %1762 = dma.vmem_to_hbm [thread:$0]  %s1757_s17, 256, %s2297_s3, [#allocation3], %s2043_s19, %s2043_s19, %s2044_s20  }
 0xe3c   :  { %2029 = dma.done.wait [#allocation3], 256  }
 0xe3d   :  { %2030 = vsyncadd [#allocation3], 4294967040 }
 0xe3e   :  { %1766 = vsyncpa [#allocation3], 1 }

</bundles_post_ra>
